<compile_context>
chip_gen: v7x
topology: tpu7x:2x2x1
jax: 0.10.0
libtpu: 0.0.40
codegen_flags: <defaults>
</compile_context>

<pallas_src>
import functools

import jax
import jax.numpy as jnp
from jax.experimental import pallas as pl
from jax.experimental.pallas import tpu as pltpu


_LANE = 128          # lane width: tiles are always a multiple of this
_MAX_TILE = 32768    # max lane-axis batch tile (multiple of 128)


def _round_up(x, m):
    return ((x + m - 1) // m) * m


def _choose_tile(batch):
    """Lane-dense tile: multiple of 128, capped at _MAX_TILE, and small enough
    that the grid has >= 2 steps when there is enough work (v7x megacore)."""
    padded = _round_up(max(int(batch), 1), _LANE)
    half = _round_up(pl.cdiv(padded, 2), _LANE)
    return min(_MAX_TILE, max(_LANE, half))


def _elu(x):
    # ELU(alpha=1): x if x > 0 else exp(x) - 1.  The min() clamp keeps the exp
    # argument non-positive (no overflow on the discarded branch, and keeps
    # garbage lanes of a ragged boundary block from blowing up).
    return jnp.where(x > 0, x, jnp.exp(jnp.minimum(x, 0.0)) - 1.0)


def _odefunc_kernel(xT_ref, w1_ref, b1_ref, w2_ref, b2_ref, w3_ref, b3_ref, oT_ref):
    """One batch tile, lane-dense: xT_ref is (dim, TB), oT_ref is (dim, TB).

    Weights are in PyTorch (out, in) layout; biases are (out, 1) so they
    broadcast along the lane (batch) axis.
    """
    xT = xT_ref[...]

    h = jnp.dot(w1_ref[...], xT, preferred_element_type=jnp.float32) + b1_ref[...]
    h = _elu(h)

    h = jnp.dot(w2_ref[...], h, preferred_element_type=jnp.float32) + b2_ref[...]
    h = _elu(h)

    out = jnp.dot(w3_ref[...], h, preferred_element_type=jnp.float32) + b3_ref[...]
    oT_ref[...] = out.astype(oT_ref.dtype)


def prepare_params(params):
    """One-time layout prep. Call once, OUTSIDE the ODE-solver loop.

    Weights keep PyTorch (out_features, in_features) layout (kernel computes
    W @ x^T, no transpose needed); biases become (out_features, 1) for
    lane-axis broadcast.
    """
    return dict(
        w1=params["w1"], b1=params["b1"].reshape(-1, 1),
        w2=params["w2"], b2=params["b2"].reshape(-1, 1),
        w3=params["w3"], b3=params["b3"].reshape(-1, 1),
    )


@jax.jit
def odefunc_forward_T(t, xT, prepared):
    """Preferred entry point for ODE solves: state kept in (dim, batch) layout.

    xT: (dim, batch) float32 -> returns (dim, batch) float32.  No transposes,
    no padding copies: the only HBM traffic is one read of xT and one write
    of the output (plus the tiny resident weights).
    """
    del t  # unused by the math, kept for API parity with the PyTorch module
    dim, batch = xT.shape
    nh = prepared["w1"].shape[0]

    tb = _choose_tile(batch)
    grid = (pl.cdiv(batch, tb),)

    resident = lambda shape: pl.BlockSpec(shape, lambda i: (0, 0))

    flops = 2 * batch * (dim * nh + nh * nh + nh * dim)
    param_bytes = (dim * nh * 2 + nh * nh + 2 * nh + 2 * dim) * 4
    io_bytes = 2 * batch * dim * 4

    return pl.pallas_call(
        _odefunc_kernel,
        out_shape=jax.ShapeDtypeStruct((dim, batch), xT.dtype),
        grid=grid,
        in_specs=[
            pl.BlockSpec((dim, tb), lambda i: (0, i)),   # x tile: pipelined
            resident((nh, dim)),                         # w1 (resident in VMEM)
            resident((nh, 1)),                           # b1
            resident((nh, nh)),                          # w2
            resident((nh, 1)),                           # b2
            resident((dim, nh)),                         # w3
            resident((dim, 1)),                          # b3
        ],
        out_specs=pl.BlockSpec((dim, tb), lambda i: (0, i)),
        compiler_params=pltpu.CompilerParams(
            dimension_semantics=("parallel",),           # v7x: shard tiles over 2 TCs
            vmem_limit_bytes=32 * 1024 * 1024,           # headroom on v5e defaults
        ),
        cost_estimate=pl.CostEstimate(
            flops=flops,
            transcendentals=2 * batch * nh,
            bytes_accessed=io_bytes + param_bytes,
        ),
    )(xT, prepared["w1"], prepared["b1"], prepared["w2"], prepared["b2"],
      prepared["w3"], prepared["b3"])


@jax.jit
def odefunc_forward(t, x, prepared):
    """PyTorch-API-parity path: x (batch, dim) -> (batch, dim).

    For a full ODE solve, keep the state in (dim, batch) layout between steps
    and call odefunc_forward_T directly to avoid the two relayout passes.
    """
    return odefunc_forward_T(t, x.T, prepared).T


def init_params(key, dim, nhidden):
    """Deterministic init mimicking nn.Linear default (uniform +-1/sqrt(fan_in))."""
    ks = jax.random.split(key, 6)

    def lin(kw, kb, fan_in, fan_out):
        bound = 1.0 / jnp.sqrt(fan_in)
        w = jax.random.uniform(kw, (fan_out, fan_in), jnp.float32, -bound, bound)
        b = jax.random.uniform(kb, (fan_out,), jnp.float32, -bound, bound)
        return w, b

    w1, b1 = lin(ks[0], ks[1], dim, nhidden)
    w2, b2 = lin(ks[2], ks[3], nhidden, nhidden)
    w3, b3 = lin(ks[4], ks[5], nhidden, dim)
    return dict(w1=w1, b1=b1, w2=w2, b2=b2, w3=w3, b3=b3)


def _reference(x, p):
    """Pure-JAX reference matching PyTorch semantics."""
    elu = lambda h: jnp.where(h > 0, h, jnp.exp(jnp.minimum(h, 0.0)) - 1.0)
    h = elu(x @ p["w1"].T + p["b1"])
    h = elu(h @ p["w2"].T + p["b2"])
    return h @ p["w3"].T + p["b3"]


if __name__ == "__main__":
    key = jax.random.PRNGKey(0)
    k_param, k_x = jax.random.split(key)

    dim, nhidden, batch = 4, 32, 8
    params = init_params(k_param, dim, nhidden)
    prepared = prepare_params(params)          # hoisted out of the per-call path
    x = jax.random.normal(k_x, (batch, dim), jnp.float32)
    t = jnp.float32(0.0)

    # (batch, dim) API-parity path (single ragged 128-lane block).
    out = jax.block_until_ready(odefunc_forward(t, x, prepared))
    ref = _reference(x, params)
    assert out.shape == (batch, dim)
    assert jnp.allclose(out, ref, atol=1e-5, rtol=1e-5)

    # Transposed fast path used inside an ODE solve (state kept as (dim, batch)).
    outT = jax.block_until_ready(odefunc_forward_T(t, x.T, prepared))
    assert outT.shape == (dim, batch)
    assert jnp.allclose(outT.T, ref, atol=1e-5, rtol=1e-5)

    # Exercise the multi-tile (grid >= 2) + ragged boundary-block path.
    big_batch = 3000
    xb = jax.random.normal(jax.random.PRNGKey(1), (big_batch, dim), jnp.float32)
    outb = jax.block_until_ready(odefunc_forward(t, xb, prepared))
    refb = _reference(xb, params)
    assert outb.shape == (big_batch, dim)
    assert jnp.allclose(outb, refb, atol=1e-4, rtol=1e-4)

    # TODO(synk): self.nfe counter is Python-side mutable state; track it in the
    # host wrapper / ODE solver, not in the kernel.
    print("KERNEL_OK")
</pallas_src>

<mosaic_0001>
module attributes {stable_mosaic.version = 11 : i64} {
  func.func @_odefunc_kernel(%arg0: i32, %arg1: memref<4x128xf32, #tpu.memory_space<vmem>>, %arg2: memref<32x4xf32, #tpu.memory_space<vmem>>, %arg3: memref<32x1xf32, #tpu.memory_space<vmem>>, %arg4: memref<32x32xf32, #tpu.memory_space<vmem>>, %arg5: memref<32x1xf32, #tpu.memory_space<vmem>>, %arg6: memref<4x32xf32, #tpu.memory_space<vmem>>, %arg7: memref<4x1xf32, #tpu.memory_space<vmem>>, %arg8: memref<4x128xf32, #tpu.memory_space<vmem>>) attributes {dimension_semantics = [#tpu.dimension_semantics<parallel>], iteration_bounds = array<i64: 1>, scalar_prefetch = 0 : i64, scratch_operands = 0 : i64, tpu.core_type = #tpu.core_type<tc>, window_params = [{transform_indices = @transform_0, window_bounds = array<i64: 4, 128>}, {pipeline_mode = #tpu.pipeline_mode<synchronous>, transform_indices = @transform_1, window_bounds = array<i64: 32, 4>}, {pipeline_mode = #tpu.pipeline_mode<synchronous>, transform_indices = @transform_2, window_bounds = array<i64: 32, 1>}, {pipeline_mode = #tpu.pipeline_mode<synchronous>, transform_indices = @transform_3, window_bounds = array<i64: 32, 32>}, {pipeline_mode = #tpu.pipeline_mode<synchronous>, transform_indices = @transform_4, window_bounds = array<i64: 32, 1>}, {pipeline_mode = #tpu.pipeline_mode<synchronous>, transform_indices = @transform_5, window_bounds = array<i64: 4, 32>}, {pipeline_mode = #tpu.pipeline_mode<synchronous>, transform_indices = @transform_6, window_bounds = array<i64: 4, 1>}, {transform_indices = @transform_7, window_bounds = array<i64: 4, 128>}]} {
    %c0 = arith.constant 0 : index
    %c0_0 = arith.constant 0 : index
    %0 = vector.load %arg1[%c0, %c0_0] : memref<4x128xf32, #tpu.memory_space<vmem>>, vector<4x128xf32>
    %c0_1 = arith.constant 0 : index
    %c0_2 = arith.constant 0 : index
    %1 = vector.load %arg2[%c0_1, %c0_2] : memref<32x4xf32, #tpu.memory_space<vmem>>, vector<32x4xf32>
    %cst = arith.constant dense<0.000000e+00> : vector<32x128xf32>
    %2 = tpu.matmul %1, %0, %cst {dimension_numbers = #tpu.dot_dimension_numbers<[1], [0], [0], [1], [0, 0, 1, 1], [], []>} : vector<32x4xf32>, vector<4x128xf32>, vector<32x128xf32> -> vector<32x128xf32>
    %c0_3 = arith.constant 0 : index
    %c0_4 = arith.constant 0 : index
    %3 = vector.load %arg3[%c0_3, %c0_4] : memref<32x1xf32, #tpu.memory_space<vmem>>, vector<32x1xf32>
    %4 = vector.broadcast %3 : vector<32x1xf32> to vector<32x128xf32>
    %5 = arith.addf %2, %4 : vector<32x128xf32>
    %cst_5 = arith.constant 0.000000e+00 : f32
    %6 = vector.broadcast %cst_5 : f32 to vector<32x128xf32>
    %7 = arith.cmpf ogt, %5, %6 : vector<32x128xf32>
    %cst_6 = arith.constant 0.000000e+00 : f32
    %8 = vector.broadcast %cst_6 : f32 to vector<32x128xf32>
    %9 = arith.minimumf %5, %8 : vector<32x128xf32>
    %10 = math.exp %9 : vector<32x128xf32>
    %cst_7 = arith.constant 1.000000e+00 : f32
    %11 = vector.broadcast %cst_7 : f32 to vector<32x128xf32>
    %12 = arith.subf %10, %11 : vector<32x128xf32>
    %13 = arith.select %7, %5, %12 : vector<32x128xi1>, vector<32x128xf32>
    %c0_8 = arith.constant 0 : index
    %c0_9 = arith.constant 0 : index
    %14 = vector.load %arg4[%c0_8, %c0_9] : memref<32x32xf32, #tpu.memory_space<vmem>>, vector<32x32xf32>
    %cst_10 = arith.constant dense<0.000000e+00> : vector<32x128xf32>
    %15 = tpu.matmul %14, %13, %cst_10 {dimension_numbers = #tpu.dot_dimension_numbers<[1], [0], [0], [1], [0, 0, 1, 1], [], []>} : vector<32x32xf32>, vector<32x128xf32>, vector<32x128xf32> -> vector<32x128xf32>
    %c0_11 = arith.constant 0 : index
    %c0_12 = arith.constant 0 : index
    %16 = vector.load %arg5[%c0_11, %c0_12] : memref<32x1xf32, #tpu.memory_space<vmem>>, vector<32x1xf32>
    %17 = vector.broadcast %16 : vector<32x1xf32> to vector<32x128xf32>
    %18 = arith.addf %15, %17 : vector<32x128xf32>
    %cst_13 = arith.constant 0.000000e+00 : f32
    %19 = vector.broadcast %cst_13 : f32 to vector<32x128xf32>
    %20 = arith.cmpf ogt, %18, %19 : vector<32x128xf32>
    %cst_14 = arith.constant 0.000000e+00 : f32
    %21 = vector.broadcast %cst_14 : f32 to vector<32x128xf32>
    %22 = arith.minimumf %18, %21 : vector<32x128xf32>
    %23 = math.exp %22 : vector<32x128xf32>
    %cst_15 = arith.constant 1.000000e+00 : f32
    %24 = vector.broadcast %cst_15 : f32 to vector<32x128xf32>
    %25 = arith.subf %23, %24 : vector<32x128xf32>
    %26 = arith.select %20, %18, %25 : vector<32x128xi1>, vector<32x128xf32>
    %c0_16 = arith.constant 0 : index
    %c0_17 = arith.constant 0 : index
    %27 = vector.load %arg6[%c0_16, %c0_17] : memref<4x32xf32, #tpu.memory_space<vmem>>, vector<4x32xf32>
    %cst_18 = arith.constant dense<0.000000e+00> : vector<4x128xf32>
    %28 = tpu.matmul %27, %26, %cst_18 {dimension_numbers = #tpu.dot_dimension_numbers<[1], [0], [0], [1], [0, 0, 1, 1], [], []>} : vector<4x32xf32>, vector<32x128xf32>, vector<4x128xf32> -> vector<4x128xf32>
    %c0_19 = arith.constant 0 : index
    %c0_20 = arith.constant 0 : index
    %29 = vector.load %arg7[%c0_19, %c0_20] : memref<4x1xf32, #tpu.memory_space<vmem>>, vector<4x1xf32>
    %30 = vector.broadcast %29 : vector<4x1xf32> to vector<4x128xf32>
    %31 = arith.addf %28, %30 : vector<4x128xf32>
    %c0_21 = arith.constant 0 : index
    %c0_22 = arith.constant 0 : index
    %32 = vector.load %arg8[%c0_21, %c0_22] : memref<4x128xf32, #tpu.memory_space<vmem>>, vector<4x128xf32>
    tpu.vector_store %arg8[%c0_21, %c0_22], %31 {strides = array<i32>} : memref<4x128xf32, #tpu.memory_space<vmem>>, vector<4x128xf32>,
    return
  }
  func.func @transform_0(%arg0: i32) -> (i32, i32) {
    %c0_i32 = arith.constant 0 : i32
    %c0_i32_0 = arith.constant 0 : i32
    return %c0_i32, %arg0 : i32, i32
  }
  func.func @transform_1(%arg0: i32) -> (i32, i32) {
    %c0_i32 = arith.constant 0 : i32
    %c0_i32_0 = arith.constant 0 : i32
    %c0_i32_1 = arith.constant 0 : i32
    return %c0_i32, %c0_i32_0 : i32, i32
  }
  func.func @transform_2(%arg0: i32) -> (i32, i32) {
    %c0_i32 = arith.constant 0 : i32
    %c0_i32_0 = arith.constant 0 : i32
    %c0_i32_1 = arith.constant 0 : i32
    return %c0_i32, %c0_i32_0 : i32, i32
  }
  func.func @transform_3(%arg0: i32) -> (i32, i32) {
    %c0_i32 = arith.constant 0 : i32
    %c0_i32_0 = arith.constant 0 : i32
    %c0_i32_1 = arith.constant 0 : i32
    return %c0_i32, %c0_i32_0 : i32, i32
  }
  func.func @transform_4(%arg0: i32) -> (i32, i32) {
    %c0_i32 = arith.constant 0 : i32
    %c0_i32_0 = arith.constant 0 : i32
    %c0_i32_1 = arith.constant 0 : i32
    return %c0_i32, %c0_i32_0 : i32, i32
  }
  func.func @transform_5(%arg0: i32) -> (i32, i32) {
    %c0_i32 = arith.constant 0 : i32
    %c0_i32_0 = arith.constant 0 : i32
    %c0_i32_1 = arith.constant 0 : i32
    return %c0_i32, %c0_i32_0 : i32, i32
  }
  func.func @transform_6(%arg0: i32) -> (i32, i32) {
    %c0_i32 = arith.constant 0 : i32
    %c0_i32_0 = arith.constant 0 : i32
    %c0_i32_1 = arith.constant 0 : i32
    return %c0_i32, %c0_i32_0 : i32, i32
  }
  func.func @transform_7(%arg0: i32) -> (i32, i32) {
    %c0_i32 = arith.constant 0 : i32
    %c0_i32_0 = arith.constant 0 : i32
    return %c0_i32, %arg0 : i32, i32
  }
}

</mosaic_0001>

<bundles_post_ra>
// kernel: odefunc_forward_T.1
= control target key start
LH: loop header
LB: loop body
LE: loop exit
PB: predicated region body
PF: predicated region fallthrough
CT: control target
= control target key end

     0   :  { %vm69_vm0 = vcmask 1043456   ;;  %vm56_vm1 = vcmask 31744   ;;  %v557_v5 = vmov 0   ;;  %s680_s0 = inlined_call_operand.vmem [shape: f32[4,8], index: 0, kind: input, shape index: {}]   ;;  %s681_s1 = inlined_call_operand.vmem [shape: f32[32,4], index: 1, kind: input, shape index: {}]   ;;  %s682_s2 = inlined_call_operand.vmem [shape: f32[32,1], index: 2, kind: input, shape index: {}]   ;;  %s683_s3 = inlined_call_operand.vmem [shape: f32[32,32], index: 3, kind: input, shape index: {}]   ;;  %s684_s4 = inlined_call_operand.vmem [shape: f32[32,1], index: 4, kind: input, shape index: {}]   ;;  %s685_s5 = inlined_call_operand.vmem [shape: f32[4,32], index: 5, kind: input, shape index: {}]   ;;  %s686_s6 = inlined_call_operand.vmem [shape: f32[4,1], index: 6, kind: input, shape index: {}]   ;;  %s687_s7 = inlined_call_operand.hbm [shape: f32[4,8], index: 7, kind: output, shape index: {}]  }
   0x1   :  { %v27_v0 = vld [vmem:[%s680_s0] sm:$0xf]  ;;  %v29_v2 = vld [vmem:[%s681_s1 + $0x8] sm:$0xff]  ;;  %v30_v3 = vld [vmem:[%s681_s1 + $0x10] sm:$0xff]  ;;  %515 = vset.pattern.permute.xlu0 %v557_v5  ;;  %516 = vset.pattern.permute.xlu1 %v557_v5 }
   0x2   :  { %v28_v1 = vld [vmem:[%s681_s1] sm:$0xff]  ;;  %463 = vmatprep.subr.msk.mxu0 %vm69_vm0, %v27_v0  ;;  %v34_v6 = vld [vmem:[%s682_s2 + $0x10] sm:$0xff]  ;;  %v31_v7 = vld [vmem:[%s681_s1 + $0x18] sm:$0xff] }
   0x3   :  { %465 = vmatprep.mubr.msk.f32.mxu0 %vm56_vm1, %v28_v1  ;;  %v32_v4 = vld [vmem:[%s682_s2] sm:$0xff]  ;;  %464 = vmatpush3.msk.msra.mxu0 %vm69_vm0, %v27_v0  ;;  %v33_v8 = vld [vmem:[%s682_s2 + $0x8] sm:$0xff] }
   0x4   :  { %466 = vmatmul.mubr.msk.f32.vlgmr.msra.gmra.mrb[0].mxu0 %vm56_vm1, %v29_v2  ;;  %38 = vperm.xlu0 %515, %v32_v4  }
   0x5   :  { %468 = vmatprep.mubr.msk.f32.mxu0 %vm56_vm1, %v30_v3 }
   0x6   :  { %12 = vsyncpa [#allocation3], 0  ;;  %48 = vperm.xlu1 %516, %v34_v6   ;;  %v35_v9 = vld [vmem:[%s682_s2 + $0x18] sm:$0xff]  ;;  %v186_v10 = vld [vmem:[%s684_s4] sm:$0xff]  ;;  %vm210_vm2 = vcmask 261120   ;;  %v558_v53 = vmov 0.0|0.0  }
   0x7   :  { %v187_v11 = vld [vmem:[%s684_s4 + $0x8] sm:$0xff]  ;;  %v188_v12 = vld [vmem:[%s684_s4 + $0x10] sm:$0xff]  ;;  %v189_v13 = vld [vmem:[%s684_s4 + $0x18] sm:$0xff]  ;;  %504 = vmatprep.subr.bf16.mxu0 %v558_v53  ;;  %vm559_vm7 = vmmov 0   ;;  %v560_v54 = vmov 0.0   ;;  %s561_s10 = smov [#allocation2]  }
   0x8   :  { %469 = vmatmul.mubr.msk.f32.gmra.mrb[2].mxu0 %vm56_vm1, %v31_v7  ;;  %43 = vperm.xlu0 %515, %v33_v8   ;;  %v333_v14 = vld [vmem:[%s686_s6] sm:$0xf]  ;;  %v183_v50 = vld [vmem:[%s683_s3 + $0x8] sm:$0xff]  ;;  %v184_v51 = vld [vmem:[%s683_s3 + $0x10] sm:$0xff]  ;;  %s419_s0 = sshll.u32 %s561_s10, 4  ;;  %s420_s0 = int_to_ptr.vmem [resolvable:$true] %s419_s0 }
   0x9   :  { %v182_v15 = vld [vmem:[%s683_s3] sm:$0xff]  ;;  %v185_v52 = vld [vmem:[%s683_s3 + $0x18] sm:$0xff]  ;;  %493 = vmatprep.mubr.msk.f32.mxu0 %vm559_vm7, %v560_v54  ;;  %s533_s11 = scalar_lea.vmem %s420_s0, 64  ;;  %p538_p1 = scmp.lt.s32.totalorder %s420_s0, %s420_s0 }
   0xa   :  { %53 = vperm.xlu1 %516, %v35_v9   ;;  %479 = vmatprep.mubr.msk.f32.mxu1 %vm210_vm2, %v182_v15  ;;  %p534_p0 = scmp.ne.s32.totalorder %s420_s0, %s533_s11  ;;  %p539_p2 = scmp.lt.s32.totalorder %s533_s11, %s533_s11 }
   0xc   :  { %192 = vperm.xlu0 %515, %v186_v10   ;;  %p540_p3 = por %p539_p2, %p538_p1 }
   0xe   :  { %197 = vperm.xlu1 %516, %v187_v11   ;;  %p541_p4 = pnand %p540_p3, %p534_p0 }
  0x10   :  { %202 = vperm.xlu0 %515, %v188_v12  }
  0x12   :  { %207 = vperm.xlu1 %516, %v189_v13  }
  0x14   :  { %336 = vperm.xlu0 %515, %v333_v14  }
  0x83   :  { %v39_v16 = vpop.permute.xlu0 %38 }
  0x85   :  { %v49_v17 = vpop.permute.xlu1 %48 }
  0x87   :  { %v44_v18 = vpop.permute.xlu0 %43 }
  0x89   :  { %v54_v24 = vpop.permute.xlu1 %53 }
  0x8b   :  { %v193_v56 = vpop.permute.xlu0 %192 }
  0x8d   :  { %v198_v55 = vpop.permute.xlu1 %197 }
  0x8f   :  { %v203_v1 = vpop.permute.xlu0 %202 }
  0x91   :  { %v208_v62 = vpop.permute.xlu1 %207 }
  0xd7   :  { %v467_v19 = vpop.f32.mrb[0].mxu0 }
  0xd8   :  { %v145_v20 = vadd.f32 %v467_v19, %v44_v18  ;;  %v139_v21 = vpop.f32.mrb[1].mxu0 }
  0xd9   :  { %v140_v22 = vadd.f32 %v139_v21, %v39_v16 }
  0xda   :  { %v163_v23 = vmin.f32 %v145_v20, 0.0  ;;  %vm159_vm3 = vcmp.gt.f32.partialorder %v145_v20, 0.0 }
  0xdb   :  { %v162_v25 = vmin.f32 %v140_v22, 0.0  ;;  %v470_v26 = vpop.f32.mrb[2].mxu0  ;;  %vm158_vm4 = vcmp.gt.f32.partialorder %v140_v22, 0.0 }
  0xdc   :  { %v168_v27 = vmul.f32 1.442695, %v163_v23  ;;  %v155_v28 = vadd.f32 %v470_v26, %v54_v24  ;;  %v149_v29 = vpop.f32.mrb[3].mxu0  ;;  %v337_v26 = vpop.permute.xlu0 %336 }
  0xdd   :  { %v166_v30 = vmul.f32 1.442695, %v162_v25  ;;  %v150_v31 = vadd.f32 %v149_v29, %v49_v17  ;;  %v332_v25 = vld [vmem:[%s685_s5] sm:$0xf] }
  0xde   :  { %517 = vpow2.f32 %v168_v27  ;;  %v165_v32 = vmin.f32 %v155_v28, 0.0  ;;  %vm161_vm5 = vcmp.gt.f32.partialorder %v155_v28, 0.0 }
  0xdf   :  { %519 = vpow2.f32 %v166_v30  ;;  %v164_v33 = vmin.f32 %v150_v31, 0.0  ;;  %vm160_vm6 = vcmp.gt.f32.partialorder %v150_v31, 0.0 }
  0xe0   :  { %v172_v34 = vmul.f32 1.442695, %v165_v32 }
  0xe1   :  { %v170_v35 = vmul.f32 1.442695, %v164_v33 }
  0xe2   :  { %521 = vpow2.f32 %v172_v34 }
  0xe3   :  { %523 = vpow2.f32 %v170_v35 }
  0xe8   :  { %v518_v36 = vpop.eup %517 }
  0xe9   :  { %v520_v37 = vpop.eup %519  ;;  %v433_v38 = vadd.f32 -1.0, %v518_v36 }
  0xea   :  { %v432_v39 = vadd.f32 -1.0, %v520_v37 }
  0xeb   :  { %v179_v40 = vsel %vm159_vm3, %v145_v20, %v433_v38 }
  0xec   :  { %v522_v41 = vpop.eup %521  ;;  %v178_v42 = vsel %vm158_vm4, %v140_v22, %v432_v39 }
  0xed   :  { %v524_v43 = vpop.eup %523  ;;  %v435_v44 = vadd.f32 -1.0, %v522_v41  ;;  %v496_v45 = vpack.c.bf16 %v179_v40, %v178_v42 }
  0xee   :  { %v434_v46 = vadd.f32 -1.0, %v524_v43 }
  0xef   :  { %497 = vmatprep.subr.bf16.mxu1 %v496_v45  ;;  %v181_v47 = vsel %vm161_vm5, %v155_v28, %v435_v44 }
  0xf0   :  { %499 = vmatpush3.bf16.msra.mxu1 %v496_v45  ;;  %v180_v48 = vsel %vm160_vm6, %v150_v31, %v434_v46 }
  0xf1   :  { %v500_v49 = vpack.c.bf16 %v181_v47, %v180_v48 }
  0xf3   :  { %501 = vmatprep.subr.bf16.mxu1 %v500_v49 }
  0xf4   :  { %503 = vmatpush3.bf16.msra.mxu1 %v500_v49 }
  0xf7   :  { %480 = vmatmul.mubr.msk.f32.vlgmr.msra.gmra.mrb[0].mxu1 %vm210_vm2, %v183_v50 }
  0xf8   :  { %482 = vmatprep.mubr.msk.f32.mxu1 %vm210_vm2, %v184_v51 }
  0xfb   :  { %483 = vmatmul.mubr.msk.f32.gmra.mrb[2].mxu1 %vm210_vm2, %v185_v52 }
 0x1ca   :  { %v481_v57 = vpop.f32.mrb[0].mxu1 }
 0x1cb   :  { %v295_v58 = vadd.f32 %v481_v57, %v198_v55  ;;  %v289_v59 = vpop.f32.mrb[1].mxu1 }
 0x1cc   :  { %v290_v60 = vadd.f32 %v289_v59, %v193_v56 }
 0x1cd   :  { %v313_v61 = vmin.f32 %v295_v58, 0.0  ;;  %vm309_vm8 = vcmp.gt.f32.partialorder %v295_v58, 0.0 }
 0x1ce   :  { %v312_v63 = vmin.f32 %v290_v60, 0.0  ;;  %v484_v0 = vpop.f32.mrb[2].mxu1  ;;  %vm308_vm9 = vcmp.gt.f32.partialorder %v290_v60, 0.0 }
 0x1cf   :  { %v318_v2 = vmul.f32 1.442695, %v313_v61  ;;  %v305_v3 = vadd.f32 %v484_v0, %v208_v62  ;;  %v299_v4 = vpop.f32.mrb[3].mxu1 }
 0x1d0   :  { %v316_v5 = vmul.f32 1.442695, %v312_v63  ;;  %v300_v6 = vadd.f32 %v299_v4, %v203_v1 }
 0x1d1   :  { %525 = vpow2.f32 %v318_v2  ;;  %v315_v7 = vmin.f32 %v305_v3, 0.0  ;;  %vm311_vm10 = vcmp.gt.f32.partialorder %v305_v3, 0.0 }
 0x1d2   :  { %527 = vpow2.f32 %v316_v5  ;;  %v314_v8 = vmin.f32 %v300_v6, 0.0  ;;  %vm310_vm11 = vcmp.gt.f32.partialorder %v300_v6, 0.0 }
 0x1d3   :  { %v322_v9 = vmul.f32 1.442695, %v315_v7 }
 0x1d4   :  { %v320_v10 = vmul.f32 1.442695, %v314_v8 }
 0x1d5   :  { %529 = vpow2.f32 %v322_v9 }
 0x1d6   :  { %531 = vpow2.f32 %v320_v10 }
 0x1db   :  { %v526_v11 = vpop.eup %525 }
 0x1dc   :  { %v528_v12 = vpop.eup %527  ;;  %v441_v13 = vadd.f32 -1.0, %v526_v11 }
 0x1dd   :  { %v440_v14 = vadd.f32 -1.0, %v528_v12 }
 0x1de   :  { %v329_v15 = vsel %vm309_vm8, %v295_v58, %v441_v13 }
 0x1df   :  { %v530_v16 = vpop.eup %529  ;;  %v328_v17 = vsel %vm308_vm9, %v290_v60, %v440_v14 }
 0x1e0   :  { %v532_v18 = vpop.eup %531  ;;  %v505_v19 = vpack.c.bf16 %v329_v15, %v328_v17  ;;  %v443_v20 = vadd.f32 -1.0, %v530_v16 }
 0x1e1   :  { %v442_v21 = vadd.f32 -1.0, %v532_v18 }
 0x1e2   :  { %v331_v22 = vsel %vm311_vm10, %v305_v3, %v443_v20  ;;  %506 = vmatpush3.bf16.msra.mxu0 %v505_v19 }
 0x1e3   :  { %v330_v23 = vsel %vm310_vm11, %v300_v6, %v442_v21  ;;  %507 = vmatprep.subr.bf16.mxu0 %v558_v53 }
 0x1e4   :  { %v508_v24 = vpack.c.bf16 %v331_v22, %v330_v23 }
 0x1e6   :  { %509 = vmatpush3.bf16.msra.mxu0 %v508_v24 }
 0x1e9   :  { %494 = vmatmul.mubr.msk.f32.vlgmr.msra.gmra.mrb[4].mxu0 %vm210_vm2, %v332_v25 }
 0x2bc   :  { %v408_v27 = vpop.f32.mrb[4].mxu0 }
 0x2bd   :  { %v409_v28 = vadd.f32 %v408_v27, %v337_v26  ;;  %v495_v29 = vpop.f32.mrb[5].mxu0 }
 0x2bf   :  { %412 = vst [vmem:[#allocation2] sm:$0xf] %v409_v28 }
 0x2c0   :  { %544 = shalt.err (!%p541_p4)
}
 0x2c1   :  { %s545_s5 = scalar_lea.hbm %s687_s7, 64 }
 0x2c2   :  { %p546_p5 = scmp.ne.s32.totalorder %s687_s7, %s545_s5  ;;  %p549_p6 = scmp.lt.u32.totalorder %s545_s5, %s687_s7 }
 0x2c4   :  { %p551_p7 = pnand %p549_p6, %p546_p5 }
 0x2c6   :  { %554 = shalt.err (!%p551_p7)
}
 0x2c7   :  { %422 = dma.vmem_to_hbm [thread:$0]  %s420_s0, 64, %s687_s7, [#allocation3]  }
 0x2c8   :  { %555 = dma.done.wait [#allocation3], 64  }
 0x2c9   :  { %556 = vsyncadd [#allocation3], 4294967232 }
 0x2ca   :  { %426 = vsyncpa [#allocation3], 1 }

</bundles_post_ra>
